<compile_context>
chip_gen: v5e
topology: v5e:2x2
jax: 0.10.0
libtpu: 0.0.40
codegen_flags: <defaults>
</compile_context>

<pallas_src>
import functools

import jax
import jax.numpy as jnp
from jax.experimental import pallas as pl
from jax.experimental.pallas import tpu as pltpu


def _class_attn_kernel(x_ref, hb_ref, kvw_ref, qw_ref, pw_ref, pb_ref, o_ref):
    """One grid step == `block_b` batch elements.

    x_ref  : (Bt, N, C)   VMEM
    hb_ref : (HD, HD)     VMEM  block-diag head indicator, pre-scaled by qk scale
    kvw_ref: (C, 2*HD)    VMEM  (k columns first, then v columns, head-major)
    qw_ref : (C, HD)      VMEM
    pw_ref : (HD, C)      VMEM
    pb_ref : (1, C)       VMEM
    o_ref  : (Bt, C)      VMEM
    """
    Bt, N, C = x_ref.shape
    HD = qw_ref.shape[1]

    x = x_ref[...]                                   # (Bt, N, C)

    # kv projection for all tokens of the tile (one big MXU matmul),
    # q projection for the class tokens only.
    kv = jnp.dot(x.reshape(Bt * N, C), kvw_ref[...],
                 preferred_element_type=jnp.float32)            # (Bt*N, 2HD)
    kv = kv.reshape(Bt, N, 2 * HD)
    k = kv[:, :, :HD]                                # (Bt, N, HD)
    v = kv[:, :, HD:]                                # (Bt, N, HD)

    q = jnp.dot(x[:, 0, :], qw_ref[...],
                preferred_element_type=jnp.float32)              # (Bt, HD)

    # Per-head attention scores without transposes / head loops:
    #   scores[b, n, h*hd+d] = scale * sum_{d' in head h} q[b, d'] * k[b, n, d']
    # The within-head contraction (and the qk scale) is done by one matmul
    # against the pre-scaled block-diagonal indicator; every lane of a head
    # block carries the same per-head score (lane-dense layout throughout).
    qk = k * q[:, None, :]                           # (Bt, N, HD)
    scores = jnp.dot(qk.reshape(Bt * N, HD), hb_ref[...],
                     preferred_element_type=jnp.float32).reshape(Bt, N, HD)

    # Numerically stable softmax over tokens (per batch, per head), with the
    # normalization deferred until after the token reduction.
    # attn_drop == identity at inference.
    scores = scores - jnp.max(scores, axis=1, keepdims=True)
    p = jnp.exp(scores)                              # (Bt, N, HD)
    denom = jnp.sum(p, axis=1)                       # (Bt, HD)
    cls_unnorm = jnp.sum(p * v, axis=1)              # (Bt, HD)
    cls_embed = cls_unnorm * pl.reciprocal(denom, approx=True)   # (Bt, HD)

    # Output projection (+ bias).  proj_drop == identity.
    out = jnp.dot(cls_embed, pw_ref[...],
                  preferred_element_type=jnp.float32) + pb_ref[...]
    o_ref[...] = out.astype(o_ref.dtype)             # (Bt, C) lane-dense store


def class_attention(x, kv_w, q_w, proj_w, proj_b, *, num_heads, head_dim,
                    block_b=None):
    """x: (B, N, C) -> (B, 1, C)."""
    B, N, C = x.shape
    HD = num_heads * head_dim
    scale = head_dim ** (-0.5)

    # Batch tile: target block_b * N >= ~256 rows for the MXU while keeping
    # the output block's sublane dim either 8-aligned or equal to the (padded)
    # full batch extent.
    if block_b is None:
        if B <= 8:
            block_b = B
        else:
            rows = max(1, -(-256 // N))              # block_b * N >= 256
            block_b = min(64, max(8, 8 * (-(-rows // 8))))
    grid_b = -(-B // block_b)
    Bp = grid_b * block_b
    if Bp != B:
        x = jnp.concatenate(
            [x, jnp.zeros((Bp - B, N, C), dtype=x.dtype)], axis=0)

    # Block-diagonal head indicator (pre-scaled by the qk scale):
    # head_block[i, j] = scale iff lanes i and j belong to the same head.
    # Host-precomputed, grid-invariant.
    lane = jnp.arange(HD) // head_dim
    head_block = (lane[:, None] == lane[None, :]).astype(jnp.float32) * scale

    # TODO(synk): for production sizes (C=384-768), the grid-invariant weight
    # inputs could use pipeline_mode=pl.Buffered(1) and bf16 storage to halve
    # their VMEM footprint (important on v7x's 64 MiB VMEM); kept conservative
    # here so lowering stays clean across JAX versions.
    out = pl.pallas_call(
        _class_attn_kernel,
        out_shape=jax.ShapeDtypeStruct((Bp, C), x.dtype),
        grid_spec=pltpu.PrefetchScalarGridSpec(
            num_scalar_prefetch=0,
            grid=(grid_b,),
            in_specs=[
                pl.BlockSpec((block_b, N, C), lambda b: (b, 0, 0)),
                pl.BlockSpec((HD, HD), lambda b: (0, 0)),
                pl.BlockSpec((C, 2 * HD), lambda b: (0, 0)),
                pl.BlockSpec((C, HD), lambda b: (0, 0)),
                pl.BlockSpec((HD, C), lambda b: (0, 0)),
                pl.BlockSpec((1, C), lambda b: (0, 0)),
            ],
            out_specs=pl.BlockSpec((block_b, C), lambda b: (b, 0)),
        ),
        compiler_params=pltpu.CompilerParams(
            dimension_semantics=("parallel",)),
    )(x, head_block, kv_w, q_w, proj_w, proj_b)

    return out[:B].reshape(B, 1, C)


def class_attention_ref(x, kv_w, q_w, proj_w, proj_b, *, num_heads, head_dim):
    """Pure-JAX reference mirroring the PyTorch forward exactly."""
    B, N, C = x.shape
    HD = num_heads * head_dim
    scale = head_dim ** (-0.5)

    kv = (x @ kv_w).reshape(B, N, 2, num_heads, head_dim).transpose(2, 0, 3, 1, 4)
    k, v = kv[0], kv[1]                                    # (B, H, N, hd)
    q = (x[:, :1, :] @ q_w).reshape(B, num_heads, 1, head_dim)
    attn = (q * scale) @ jnp.swapaxes(k, -2, -1)           # (B, H, 1, N)
    attn = jax.nn.softmax(attn, axis=-1)
    cls_embed = (attn @ v).transpose(0, 2, 1, 3).reshape(B, 1, HD)
    return cls_embed @ proj_w + proj_b[0]


if __name__ == "__main__":
    # Small, module-consistent shapes.
    B, N, C = 2, 16, 64
    num_heads, head_dim = 8, 8            # dim // num_heads
    HD = num_heads * head_dim

    key = jax.random.PRNGKey(0)
    kx, kkv, kq, kpw, kpb = jax.random.split(key, 5)

    x = jax.random.normal(kx, (B, N, C), dtype=jnp.float32)

    # Deterministic synthetic parameters (qkv_bias=False; proj has a bias).
    kv_w = jax.random.normal(kkv, (C, 2 * HD), dtype=jnp.float32) * 0.02
    q_w = jax.random.normal(kq, (C, HD), dtype=jnp.float32) * 0.02
    proj_w = jax.random.normal(kpw, (HD, C), dtype=jnp.float32) * 0.02
    proj_b = jax.random.normal(kpb, (1, C), dtype=jnp.float32) * 0.02

    out = class_attention(x, kv_w, q_w, proj_w, proj_b,
                          num_heads=num_heads, head_dim=head_dim)
    out = jax.block_until_ready(out)

    ref = class_attention_ref(x, kv_w, q_w, proj_w, proj_b,
                              num_heads=num_heads, head_dim=head_dim)
    assert out.shape == (B, 1, C)
    # Tolerance slightly loosened vs. exact-f32: approx reciprocal in softmax.
    assert jnp.allclose(out, ref, atol=2e-3, rtol=2e-3), "mismatch vs reference"

    print("KERNEL_OK")
</pallas_src>

<mosaic_0001>
module attributes {stable_mosaic.version = 11 : i64} {
  func.func @_class_attn_kernel(%arg0: i32, %arg1: memref<2x16x64xf32, #tpu.memory_space<vmem>>, %arg2: memref<64x64xf32, #tpu.memory_space<vmem>>, %arg3: memref<64x128xf32, #tpu.memory_space<vmem>>, %arg4: memref<64x64xf32, #tpu.memory_space<vmem>>, %arg5: memref<64x64xf32, #tpu.memory_space<vmem>>, %arg6: memref<1x64xf32, #tpu.memory_space<vmem>>, %arg7: memref<2x64xf32, #tpu.memory_space<vmem>>) attributes {dimension_semantics = [#tpu.dimension_semantics<parallel>], iteration_bounds = array<i64: 1>, scalar_prefetch = 0 : i64, scratch_operands = 0 : i64, tpu.core_type = #tpu.core_type<tc>, window_params = [{transform_indices = @transform_0, window_bounds = array<i64: 2, 16, 64>}, {pipeline_mode = #tpu.pipeline_mode<synchronous>, transform_indices = @transform_1, window_bounds = array<i64: 64, 64>}, {pipeline_mode = #tpu.pipeline_mode<synchronous>, transform_indices = @transform_2, window_bounds = array<i64: 64, 128>}, {pipeline_mode = #tpu.pipeline_mode<synchronous>, transform_indices = @transform_3, window_bounds = array<i64: 64, 64>}, {pipeline_mode = #tpu.pipeline_mode<synchronous>, transform_indices = @transform_4, window_bounds = array<i64: 64, 64>}, {pipeline_mode = #tpu.pipeline_mode<synchronous>, transform_indices = @transform_5, window_bounds = array<i64: 1, 64>}, {transform_indices = @transform_6, window_bounds = array<i64: 2, 64>}]} {
    %c0 = arith.constant 0 : index
    %c0_0 = arith.constant 0 : index
    %c0_1 = arith.constant 0 : index
    %0 = vector.load %arg1[%c0, %c0_0, %c0_1] : memref<2x16x64xf32, #tpu.memory_space<vmem>>, vector<2x16x64xf32>
    %1 = vector.shape_cast %0 : vector<2x16x64xf32> to vector<32x64xf32>
    %c0_2 = arith.constant 0 : index
    %c0_3 = arith.constant 0 : index
    %2 = vector.load %arg3[%c0_2, %c0_3] : memref<64x128xf32, #tpu.memory_space<vmem>>, vector<64x128xf32>
    %cst = arith.constant dense<0.000000e+00> : vector<32x128xf32>
    %3 = tpu.matmul %1, %2, %cst {dimension_numbers = #tpu.dot_dimension_numbers<[1], [0], [0], [1], [0, 0, 1, 1], [], []>} : vector<32x64xf32>, vector<64x128xf32>, vector<32x128xf32> -> vector<32x128xf32>
    %4 = vector.shape_cast %3 : vector<32x128xf32> to vector<2x16x128xf32>
    %5 = vector.extract_strided_slice %4 {offsets = [0, 0, 0], sizes = [2, 16, 64], strides = [1, 1, 1]} : vector<2x16x128xf32> to vector<2x16x64xf32>
    %6 = vector.extract_strided_slice %4 {offsets = [0, 0, 64], sizes = [2, 16, 64], strides = [1, 1, 1]} : vector<2x16x128xf32> to vector<2x16x64xf32>
    %7 = vector.extract_strided_slice %0 {offsets = [0, 0, 0], sizes = [2, 1, 64], strides = [1, 1, 1]} : vector<2x16x64xf32> to vector<2x1x64xf32>
    %8 = vector.shape_cast %7 : vector<2x1x64xf32> to vector<2x64xf32>
    %c0_4 = arith.constant 0 : index
    %c0_5 = arith.constant 0 : index
    %9 = vector.load %arg4[%c0_4, %c0_5] : memref<64x64xf32, #tpu.memory_space<vmem>>, vector<64x64xf32>
    %cst_6 = arith.constant dense<0.000000e+00> : vector<2x64xf32>
    %10 = tpu.matmul %8, %9, %cst_6 {dimension_numbers = #tpu.dot_dimension_numbers<[1], [0], [0], [1], [0, 0, 1, 1], [], []>} : vector<2x64xf32>, vector<64x64xf32>, vector<2x64xf32> -> vector<2x64xf32>
    %11 = vector.shape_cast %10 : vector<2x64xf32> to vector<2x1x64xf32>
    %12 = vector.broadcast %11 : vector<2x1x64xf32> to vector<2x16x64xf32>
    %13 = arith.mulf %5, %12 : vector<2x16x64xf32>
    %14 = vector.shape_cast %13 : vector<2x16x64xf32> to vector<32x64xf32>
    %c0_7 = arith.constant 0 : index
    %c0_8 = arith.constant 0 : index
    %15 = vector.load %arg2[%c0_7, %c0_8] : memref<64x64xf32, #tpu.memory_space<vmem>>, vector<64x64xf32>
    %cst_9 = arith.constant dense<0.000000e+00> : vector<32x64xf32>
    %16 = tpu.matmul %14, %15, %cst_9 {dimension_numbers = #tpu.dot_dimension_numbers<[1], [0], [0], [1], [0, 0, 1, 1], [], []>} : vector<32x64xf32>, vector<64x64xf32>, vector<32x64xf32> -> vector<32x64xf32>
    %17 = vector.shape_cast %16 : vector<32x64xf32> to vector<2x16x64xf32>
    %cst_10 = arith.constant dense<0xFF800000> : vector<2x64xf32>
    %18 = vector.multi_reduction <maximumf>, %17, %cst_10 [1] : vector<2x16x64xf32> to vector<2x64xf32>
    %19 = vector.shape_cast %18 : vector<2x64xf32> to vector<2x1x64xf32>
    %20 = vector.broadcast %19 : vector<2x1x64xf32> to vector<2x16x64xf32>
    %21 = arith.subf %17, %20 : vector<2x16x64xf32>
    %22 = math.exp %21 : vector<2x16x64xf32>
    %cst_11 = arith.constant dense<0.000000e+00> : vector<2x64xf32>
    %23 = vector.multi_reduction <add>, %22, %cst_11 [1] : vector<2x16x64xf32> to vector<2x64xf32>
    %24 = arith.mulf %22, %6 : vector<2x16x64xf32>
    %cst_12 = arith.constant dense<0.000000e+00> : vector<2x64xf32>
    %25 = vector.multi_reduction <add>, %24, %cst_12 [1] : vector<2x16x64xf32> to vector<2x64xf32>
    %26 = tpu.reciprocal %23 {approx = true} : vector<2x64xf32> -> vector<2x64xf32>
    %27 = arith.mulf %25, %26 : vector<2x64xf32>
    %c0_13 = arith.constant 0 : index
    %c0_14 = arith.constant 0 : index
    %28 = vector.load %arg5[%c0_13, %c0_14] : memref<64x64xf32, #tpu.memory_space<vmem>>, vector<64x64xf32>
    %cst_15 = arith.constant dense<0.000000e+00> : vector<2x64xf32>
    %29 = tpu.matmul %27, %28, %cst_15 {dimension_numbers = #tpu.dot_dimension_numbers<[1], [0], [0], [1], [0, 0, 1, 1], [], []>} : vector<2x64xf32>, vector<64x64xf32>, vector<2x64xf32> -> vector<2x64xf32>
    %c0_16 = arith.constant 0 : index
    %c0_17 = arith.constant 0 : index
    %30 = vector.load %arg6[%c0_16, %c0_17] : memref<1x64xf32, #tpu.memory_space<vmem>>, vector<1x64xf32>
    %31 = vector.broadcast %30 : vector<1x64xf32> to vector<2x64xf32>
    %32 = arith.addf %29, %31 : vector<2x64xf32>
    %c0_18 = arith.constant 0 : index
    %c0_19 = arith.constant 0 : index
    %33 = vector.load %arg7[%c0_18, %c0_19] : memref<2x64xf32, #tpu.memory_space<vmem>>, vector<2x64xf32>
    tpu.vector_store %arg7[%c0_18, %c0_19], %32 {strides = array<i32>} : memref<2x64xf32, #tpu.memory_space<vmem>>, vector<2x64xf32>,
    return
  }
  func.func @transform_0(%arg0: i32) -> (i32, i32, i32) {
    %c0_i32 = arith.constant 0 : i32
    %c0_i32_0 = arith.constant 0 : i32
    %c0_i32_1 = arith.constant 0 : i32
    return %arg0, %c0_i32, %c0_i32_0 : i32, i32, i32
  }
  func.func @transform_1(%arg0: i32) -> (i32, i32) {
    %c0_i32 = arith.constant 0 : i32
    %c0_i32_0 = arith.constant 0 : i32
    %c0_i32_1 = arith.constant 0 : i32
    return %c0_i32, %c0_i32_0 : i32, i32
  }
  func.func @transform_2(%arg0: i32) -> (i32, i32) {
    %c0_i32 = arith.constant 0 : i32
    %c0_i32_0 = arith.constant 0 : i32
    %c0_i32_1 = arith.constant 0 : i32
    return %c0_i32, %c0_i32_0 : i32, i32
  }
  func.func @transform_3(%arg0: i32) -> (i32, i32) {
    %c0_i32 = arith.constant 0 : i32
    %c0_i32_0 = arith.constant 0 : i32
    %c0_i32_1 = arith.constant 0 : i32
    return %c0_i32, %c0_i32_0 : i32, i32
  }
  func.func @transform_4(%arg0: i32) -> (i32, i32) {
    %c0_i32 = arith.constant 0 : i32
    %c0_i32_0 = arith.constant 0 : i32
    %c0_i32_1 = arith.constant 0 : i32
    return %c0_i32, %c0_i32_0 : i32, i32
  }
  func.func @transform_5(%arg0: i32) -> (i32, i32) {
    %c0_i32 = arith.constant 0 : i32
    %c0_i32_0 = arith.constant 0 : i32
    %c0_i32_1 = arith.constant 0 : i32
    return %c0_i32, %c0_i32_0 : i32, i32
  }
  func.func @transform_6(%arg0: i32) -> (i32, i32) {
    %c0_i32 = arith.constant 0 : i32
    %c0_i32_0 = arith.constant 0 : i32
    return %arg0, %c0_i32 : i32, i32
  }
}

</mosaic_0001>

<bundles_post_ra>
// kernel: tpu_custom_call.1
= control target key start
LH: loop header
LB: loop body
LE: loop exit
PB: predicated region body
PF: predicated region fallthrough
CT: control target
= control target key end

     0   :  { %11 = vsyncpa [#allocation3], 0  ;;  %s669_s0 = inlined_call_operand.hbm [shape: f32[2,16,64], index: 0, kind: input, shape index: {}]   ;;  %s670_s1 = inlined_call_operand.hbm [shape: f32[64,64], index: 1, kind: input, shape index: {}]   ;;  %s671_s2 = inlined_call_operand.hbm [shape: f32[64,128], index: 2, kind: input, shape index: {}]   ;;  %s672_s3 = inlined_call_operand.hbm [shape: f32[64,64], index: 3, kind: input, shape index: {}]   ;;  %s673_s4 = inlined_call_operand.hbm [shape: f32[64,64], index: 4, kind: input, shape index: {}]   ;;  %s674_s5 = inlined_call_operand.vmem [shape: f32[1,64], index: 5, kind: input, shape index: {}]   ;;  %s675_s6 = inlined_call_operand.hbm [shape: f32[2,64], index: 6, kind: output, shape index: {}]  }
   0x1   :  { %12 = vsyncpa [#allocation6], 0 }
   0x2   :  { %13 = vsyncpa [#allocation9], 0 }
   0x3   :  { %14 = vsyncpa [#allocation4], 0  ;;  %s32_s23 = sshll.u32 %s670_s1, 4  ;;  %s580_s24 = smov [#allocation5]   ;;  %s33_s23 = int_to_ptr.hbm [resolvable:$true] %s32_s23 }
   0x4   :  { %s34_s25 = sshll.u32 %s580_s24, 4  ;;  %s58_s28 = sshll.u32 %s672_s3, 4  ;;  %s35_s25 = int_to_ptr.vmem [resolvable:$true] %s34_s25  ;;  %s59_s28 = int_to_ptr.hbm [resolvable:$true] %s58_s28 }
   0x5   :  { %s581_s29 = smov 128   ;;  %s582_s30 = smov 8  }
   0x6   :  { %40 = dma.hbm_to_vmem [thread:$0]  %s33_s23, 1024, %s35_s25, [#allocation6], %s581_s29, %s581_s29, %s582_s30  }
   0x7   :  { %s583_s7 = smov [#allocation8]   ;;  %s19_s11 = sshll.u32 %s669_s0, 4  ;;  %s20_s11 = int_to_ptr.hbm [resolvable:$true] %s19_s11 }
   0x8   :  { %s60_s8 = sshll.u32 %s583_s7, 4  ;;  %s45_s13 = sshll.u32 %s671_s2, 4  ;;  %s61_s8 = int_to_ptr.vmem [resolvable:$true] %s60_s8  ;;  %s46_s13 = int_to_ptr.hbm [resolvable:$true] %s45_s13 }
   0x9   :  { %66 = dma.hbm_to_vmem [thread:$0]  %s59_s28, 1024, %s61_s8, [#allocation9], %s581_s29, %s581_s29, %s582_s30  }
   0xa   :  { %s584_s14 = smov [#allocation2]   ;;  %s585_s3 = smov [#allocation7]  }
   0xb   :  { %s21_s15 = sshll.u32 %s584_s14, 4  ;;  %s47_s16 = sshll.u32 %s585_s3, 4  ;;  %s22_s15 = int_to_ptr.vmem [resolvable:$true] %s21_s15  ;;  %s48_s16 = int_to_ptr.vmem [resolvable:$true] %s47_s16 }
   0xc   :  { %27 = dma.hbm_to_vmem [thread:$0]  %s20_s11, 512, %s22_s15, [#allocation3], %s581_s29, %s581_s29, %s582_s30  }
   0xd   :  { %s71_s19 = sshll.u32 %s673_s4, 4  ;;  %s586_s0 = smov [#allocation10]   ;;  %s72_s19 = int_to_ptr.hbm [resolvable:$true] %s71_s19 }
   0xe   :  { %53 = dma.hbm_to_vmem [thread:$0]  %s46_s13, 1024, %s48_s16, [#allocation6], %s581_s29, %s581_s29, %s582_s30  }
   0xf   :  { %s73_s20 = sshll.u32 %s586_s0, 4  ;;  %s74_s20 = int_to_ptr.vmem [resolvable:$true] %s73_s20 }
  0x10   :  { %79 = dma.hbm_to_vmem [thread:$0]  %s72_s19, 1024, %s74_s20, [#allocation9], %s581_s29, %s581_s29, %s582_s30  }
  0x11   :  { %572 = dma.done.wait [#allocation3], 512  }
  0x12   :  { %573 = vsyncadd [#allocation3], 4294966784 }
  0x13   :  { %574 = dma.done.wait [#allocation6], 2048  }
  0x14   :  { %575 = vsyncadd [#allocation6], 4294965248 }
  0x15   :  { %576 = dma.done.wait [#allocation9], 2048  }
  0x16   :  { %577 = vsyncadd [#allocation9], 4294965248  ;;  %v113_v0 = vld [vmem:[#allocation7 + $0x38] sm:$0xff]  ;;  %v112_v2 = vld [vmem:[#allocation7 + $0x30] sm:$0xff]  ;;  %vm165_vm0 = vcmask 1041409   ;;  %vm114_vm1 = vcmask 523264  }
  0x17   :  { %v163_v1 = vld [vmem:[#allocation8 + $0x38] sm:$0xff]  ;;  %135 = vmatpush.msra.mxu0 %v113_v0  ;;  %v162_v3 = vld [vmem:[#allocation8 + $0x30] sm:$0xff]  ;;  %v111_v4 = vld [vmem:[#allocation7 + $0x28] sm:$0xff]  ;;  %s587_s2 = smov 64   ;;  %s588_s22 = smov [#allocation11]   ;;  %vm375_vm2 = vcmask 517120  }
  0x18   :  { %177 = vmatpush.msra.mxu1 %v163_v1  ;;  %v161_v5 = vld [vmem:[#allocation8 + $0x28] sm:$0xff]  ;;  %v110_v6 = vld [vmem:[#allocation7 + $0x20] sm:$0xff]  ;;  %v109_v8 = vld [vmem:[#allocation7 + $0x18] sm:$0xff]  ;;  %s382_s23 = sshll.u32 %s588_s22, 4  ;;  %s384_s26 = sshll.u32 %s675_s6, 4  ;;  %s383_s23 = int_to_ptr.vmem [resolvable:$true] %s382_s23  ;;  %s385_s26 = int_to_ptr.hbm [resolvable:$true] %s384_s26 }
  0x19   :  { %136 = vmatpush.msra.mxu0 %v112_v2  ;;  %v160_v7 = vld [vmem:[#allocation8 + $0x20] sm:$0xff]  ;;  %v159_v9 = vld [vmem:[#allocation8 + $0x18] sm:$0xff]  ;;  %v104_v10 = vld [vmem:[#allocation2 + $0x10] sm:$0xff] }
  0x1a   :  { %178 = vmatpush.msra.mxu1 %v162_v3  ;;  %v108_v11 = vld [vmem:[#allocation7 + $0x10] sm:$0xff]  ;;  %v206_v13 = vld [vmem:[#allocation5 + $0x38] sm:$0xff]  ;;  %v164_v14 = vrot.slane %v104_v10, 7  ;;  %v107_v16 = vld [vmem:[#allocation7 + $0x8] sm:$0xff] }
  0x1b   :  { %137 = vmatpush.msra.mxu0 %v111_v4  ;;  %v158_v12 = vld [vmem:[#allocation8 + $0x10] sm:$0xff]  ;;  %v157_v17 = vld [vmem:[#allocation8 + $0x8] sm:$0xff]  ;;  %v102_v18 = vld [vmem:[#allocation2] sm:$0xff]  ;;  %227 = vmatpush.msra.mxu2 %v206_v13 }
  0x1c   :  { %179 = vmatpush.msra.mxu1 %v161_v5  ;;  %v205_v15 = vld [vmem:[#allocation5 + $0x30] sm:$0xff]  ;;  %v204_v19 = vld [vmem:[#allocation5 + $0x28] sm:$0xff]  ;;  %v106_v20 = vld [vmem:[#allocation7] sm:$0xff]  ;;  %v166_v22 = vsel %vm165_vm0, %v164_v14, %v102_v18 }
  0x1d   :  { %138 = vmatpush.msra.mxu0 %v110_v6  ;;  %v156_v21 = vld [vmem:[#allocation8] sm:$0xff]  ;;  %228 = vmatpush.msra.mxu2 %v205_v15  ;;  %v202_v24 = vld [vmem:[#allocation5 + $0x18] sm:$0xff]  ;;  %v103_v25 = vld [vmem:[#allocation2 + $0x8] sm:$0xff] }
  0x1e   :  { %180 = vmatpush.msra.mxu1 %v160_v7  ;;  %v203_v23 = vld [vmem:[#allocation5 + $0x20] sm:$0xff]  ;;  %v105_v26 = vld [vmem:[#allocation2 + $0x18] sm:$0xff]  ;;  %v201_v27 = vld [vmem:[#allocation5 + $0x10] sm:$0xff] }
  0x1f   :  { %139 = vmatpush.msra.mxu0 %v109_v8  ;;  %229 = vmatpush.msra.mxu2 %v204_v19  ;;  %v200_v28 = vld [vmem:[#allocation5 + $0x8] sm:$0xff]  ;;  %v199_v29 = vld [vmem:[#allocation5] sm:$0xff]  ;;  %v345_v63 = vld [vmem:[#allocation10 + $0x38] sm:$0xff] }
  0x20   :  { %181 = vmatpush.msra.mxu1 %v159_v9  ;;  %363 = vmatpush.msra.mxu3 %v345_v63  ;;  %v344_v2 = vld [vmem:[#allocation10 + $0x30] sm:$0xff]  ;;  %v343_v3 = vld [vmem:[#allocation10 + $0x28] sm:$0xff]  ;;  %v342_v5 = vld [vmem:[#allocation10 + $0x20] sm:$0xff] }
  0x21   :  { %140 = vmatpush.msra.mxu0 %v108_v11  ;;  %230 = vmatpush.msra.mxu2 %v203_v23  ;;  %v340_v14 = vld [vmem:[#allocation10 + $0x10] sm:$0xff] }
  0x22   :  { %182 = vmatpush.msra.mxu1 %v158_v12  ;;  %364 = vmatpush.msra.mxu3 %v344_v2 }
  0x23   :  { %141 = vmatpush.msra.mxu0 %v107_v16  ;;  %231 = vmatpush.msra.mxu2 %v202_v24  ;;  %v339_v16 = vld [vmem:[#allocation10 + $0x8] sm:$0xff]  ;;  %v338_v24 = vld [vmem:[#allocation10] sm:$0xff] }
  0x24   :  { %183 = vmatpush.msra.mxu1 %v157_v17  ;;  %365 = vmatpush.msra.mxu3 %v343_v3 }
  0x25   :  { %142 = vmatpush.msra.mxu0 %v106_v20  ;;  %232 = vmatpush.msra.mxu2 %v201_v27 }
  0x26   :  { %184 = vmatpush.msra.mxu1 %v156_v21  ;;  %396 = vmatmul.msk.f32.vlgmr.msra.gmra.mxu0 %vm114_vm1, %v102_v18 }
  0x27   :  { %400 = vmatmul.msk.f32.vlgmr.msra.gmra.mxu1 %vm114_vm1, %v166_v22  ;;  %233 = vmatpush.msra.mxu2 %v200_v28 }
  0x28   :  { %366 = vmatpush.msra.mxu3 %v342_v5  ;;  %v415_v5 = vld [vmem:[%s674_s5] ss:$0 sm:$0xff] }
  0x29   :  { %234 = vmatpush.msra.mxu2 %v199_v29 }
  0x2e   :  { %397 = vmatmul.msk.f32.gmra.mxu0 %vm114_vm1, %v103_v25 }
  0x36   :  { %398 = vmatmul.msk.f32.gmra.mxu0 %vm114_vm1, %v104_v10  ;;  %v341_v10 = vld [vmem:[#allocation10 + $0x18] sm:$0xff] }
  0x37   :  { %367 = vmatpush.msra.mxu3 %v341_v10 }
  0x39   :  { %368 = vmatpush.msra.mxu3 %v340_v14 }
  0x3b   :  { %369 = vmatpush.msra.mxu3 %v339_v16 }
  0x3d   :  { %370 = vmatpush.msra.mxu3 %v338_v24 }
  0x3e   :  { %399 = vmatmul.msk.f32.gmra.mxu0 %vm114_vm1, %v105_v26 }
  0xa3   :  { %v144_v30 = vpop.f32.mrf.mxu0 }
  0xa4   :  { %v186_v31 = vpop.f32.mrf.mxu1  ;;  %300 = vrot.lane.b32.xlu0 %v144_v30, %s587_s2 }
  0xa5   :  { %v191_v32 = vperm.slane %v186_v31, 0  ;;  %v190_v36 = vrot.slane %v186_v31, 1 }
  0xa7   :  { %v195_v33 = vmul.f32 %v191_v32, %v144_v30  ;;  %v192_v38 = vperm.slane %v190_v36, 0 }
  0xa9   :  { %401 = vmatmul.msk.f32.vlgmr.msra.gmra.mxu2 %vm114_vm1, %v195_v33 }
  0xab   :  { %v147_v34 = vpop.f32.mrf.mxu0 }
  0xac   :  { %302 = vrot.lane.b32.xlu0 %v147_v34, %s587_s2  ;;  %v196_v35 = vmul.f32 %v191_v32, %v147_v34 }
  0xb1   :  { %402 = vmatmul.msk.f32.gmra.mxu2 %vm114_vm1, %v196_v35 }
  0xb3   :  { %v150_v37 = vpop.f32.mrf.mxu0 }
  0xb4   :  { %304 = vrot.lane.b32.xlu1 %v150_v37, %s587_s2  ;;  %v197_v39 = vmul.f32 %v192_v38, %v150_v37 }
  0xb9   :  { %403 = vmatmul.msk.f32.gmra.mxu2 %vm114_vm1, %v197_v39 }
  0xbb   :  { %v153_v40 = vpop.f32.mrf.mxu0 }
  0xbc   :  { %306 = vrot.lane.b32.xlu1 %v153_v40, %s587_s2  ;;  %v198_v41 = vmul.f32 %v192_v38, %v153_v40 }
  0xc1   :  { %404 = vmatmul.msk.f32.gmra.mxu2 %vm114_vm1, %v198_v41 }
 0x116   :  { %v301_v0 = vpop.permute.xlu0 %300 }
 0x11e   :  { %v303_v17 = vpop.permute.xlu0 %302 }
 0x126   :  { %v305_v20 = vpop.permute.xlu1 %304 }
 0x12c   :  { %v236_v42 = vpop.f32.mrf.mxu2 }
 0x12d   :  { %v248_v44 = vsel %vm114_vm1, %v236_v42, -inf }
 0x12e   :  { %v307_v34 = vpop.permute.xlu1 %306 }
 0x134   :  { %v239_v43 = vpop.f32.mrf.mxu2 }
 0x135   :  { %v249_v45 = vsel %vm114_vm1, %v239_v43, -inf }
 0x136   :  { %v250_v46 = vmax.f32 %v248_v44, %v249_v45 }
 0x138   :  { %v251_v47 = vrot.slane %v250_v46, 4 }
 0x13a   :  { %v252_v48 = vmax.f32 %v250_v46, %v251_v47 }
 0x13c   :  { %v253_v49 = vrot.slane %v252_v48, 2  ;;  %v242_v50 = vpop.f32.mrf.mxu2 }
 0x13d   :  { %v257_v57 = vsel %vm114_vm1, %v242_v50, -inf }
 0x13e   :  { %v254_v51 = vmax.f32 %v252_v48, %v253_v49 }
 0x140   :  { %v255_v52 = vrot.slane %v254_v51, 1 }
 0x142   :  { %v256_v53 = vmax.f32 %v254_v51, %v255_v52 }
 0x144   :  { %v266_v54 = vsub.f32 %v236_v42, %v256_v53  ;;  %v267_v55 = vsub.f32 %v239_v43, %v256_v53  ;;  %v245_v56 = vpop.f32.mrf.mxu2 }
 0x145   :  { %v258_v58 = vsel %vm114_vm1, %v245_v56, -inf }
 0x146   :  { %v270_v59 = vmul.f32 1.442695, %v266_v54  ;;  %v272_v60 = vmul.f32 1.442695, %v267_v55  ;;  %v259_v61 = vmax.f32 %v257_v57, %v258_v58 }
 0x148   :  { %416 = vpow2.f32 %v270_v59  ;;  %v260_v62 = vrot.slane %v259_v61, 4 }
 0x149   :  { %418 = vpow2.f32 %v272_v60 }
 0x14a   :  { %v261_v1 = vmax.f32 %v259_v61, %v260_v62 }
 0x14c   :  { %v262_v4 = vrot.slane %v261_v1, 2 }
 0x14e   :  { %v417_v6 = vpop.eup %416  ;;  %v263_v7 = vmax.f32 %v261_v1, %v262_v4 }
 0x14f   :  { %v419_v8 = vpop.eup %418  ;;  %v278_v9 = vsel %vm114_vm1, %v417_v6, 0.0  ;;  %v312_v22 = vmul.f32 %v417_v6, %v301_v0 }
 0x150   :  { %v279_v11 = vsel %vm114_vm1, %v419_v8, 0.0  ;;  %v264_v12 = vrot.slane %v263_v7, 1  ;;  %v313_v23 = vmul.f32 %v419_v8, %v303_v17 }
 0x151   :  { %v280_v13 = vadd.f32 %v279_v11, %v278_v9  ;;  %v316_v28 = vsel %vm114_vm1, %v312_v22, 0.0 }
 0x152   :  { %v265_v15 = vmax.f32 %v263_v7, %v264_v12  ;;  %v317_v29 = vsel %vm114_vm1, %v313_v23, 0.0 }
 0x153   :  { %v281_v21 = vrot.slane %v280_v13, 4  ;;  %v318_v30 = vadd.f32 %v317_v29, %v316_v28 }
 0x154   :  { %v268_v18 = vsub.f32 %v242_v50, %v265_v15  ;;  %v269_v19 = vsub.f32 %v245_v56, %v265_v15 }
 0x155   :  { %v282_v27 = vadd.f32 %v281_v21, %v280_v13  ;;  %v319_v39 = vrot.slane %v318_v30, 4 }
 0x156   :  { %v274_v25 = vmul.f32 1.442695, %v268_v18  ;;  %v276_v26 = vmul.f32 1.442695, %v269_v19 }
 0x157   :  { %v283_v31 = vrot.slane %v282_v27, 2  ;;  %v320_v46 = vadd.f32 %v319_v39, %v318_v30 }
 0x158   :  { %420 = vpow2.f32 %v274_v25 }
 0x159   :  { %422 = vpow2.f32 %v276_v26  ;;  %v284_v40 = vadd.f32 %v283_v31, %v282_v27  ;;  %v321_v52 = vrot.slane %v320_v46, 2 }
 0x15b   :  { %v285_v49 = vrot.slane %v284_v40, 1  ;;  %v322_v57 = vadd.f32 %v321_v52, %v320_v46 }
 0x15d   :  { %v286_v54 = vadd.f32 %v285_v49, %v284_v40  ;;  %v323_v60 = vrot.slane %v322_v57, 1 }
 0x15e   :  { %v421_v32 = vpop.eup %420 }
 0x15f   :  { %v423_v33 = vpop.eup %422  ;;  %v287_v35 = vsel %vm114_vm1, %v421_v32, 0.0  ;;  %v314_v36 = vmul.f32 %v421_v32, %v305_v20  ;;  %424 = vrcp.f32 %v286_v54  ;;  %v324_v63 = vadd.f32 %v323_v60, %v322_v57 }
 0x160   :  { %v288_v37 = vsel %vm114_vm1, %v423_v33, 0.0  ;;  %v315_v38 = vmul.f32 %v423_v33, %v307_v34 }
 0x161   :  { %v289_v41 = vadd.f32 %v288_v37, %v287_v35  ;;  %v325_v42 = vsel %vm114_vm1, %v314_v36, 0.0 }
 0x162   :  { %v326_v43 = vsel %vm114_vm1, %v315_v38, 0.0 }
 0x163   :  { %v290_v44 = vrot.slane %v289_v41, 4  ;;  %v327_v45 = vadd.f32 %v326_v43, %v325_v42 }
 0x165   :  { %v291_v47 = vadd.f32 %v290_v44, %v289_v41  ;;  %v328_v48 = vrot.slane %v327_v45, 4  ;;  %v425_v62 = vpop.eup %424 }
 0x166   :  { %v336_v2 = vmul.f32 %v425_v62, %v324_v63 }
 0x167   :  { %v292_v50 = vrot.slane %v291_v47, 2  ;;  %v329_v51 = vadd.f32 %v328_v48, %v327_v45 }
 0x169   :  { %v293_v53 = vadd.f32 %v292_v50, %v291_v47  ;;  %v330_v55 = vrot.slane %v329_v51, 2 }
 0x16b   :  { %v294_v56 = vrot.slane %v293_v53, 1  ;;  %v331_v58 = vadd.f32 %v330_v55, %v329_v51 }
 0x16d   :  { %v295_v59 = vadd.f32 %v294_v56, %v293_v53  ;;  %v332_v61 = vrot.slane %v331_v58, 1 }
 0x16f   :  { %426 = vrcp.f32 %v295_v59  ;;  %v333_v0 = vadd.f32 %v332_v61, %v331_v58 }
 0x175   :  { %v427_v1 = vpop.eup %426 }
 0x176   :  { %v337_v3 = vmul.f32 %v427_v1, %v333_v0 }
 0x178   :  { %v352_v4 = vsel %vm165_vm0, %v337_v3, %v336_v2 }
 0x179   :  { %405 = vmatmul.msk.f32.vlgmr.msra.gmra.mxu3 %vm114_vm1, %v352_v4 }
 0x1fc   :  { %v372_v6 = vpop.f32.mrf.mxu3 }
 0x1fd   :  { %v373_v7 = vadd.f32 %v415_v5, %v372_v6 }
 0x1ff   :  { %376 = vst.msk [vmem:[#allocation11] sm:$0x3] %vm375_vm2, %v373_v7 }
 0x200   :  { %387 = dma.vmem_to_hbm [thread:$0]  %s383_s23, 32, %s385_s26, [#allocation4]  }
 0x201   :  { %578 = dma.done.wait [#allocation4], 32  }
 0x202   :  { %579 = vsyncadd [#allocation4], 4294967264 }
 0x203   :  { %392 = vsyncpa [#allocation3], 1 }
 0x204   :  { %393 = vsyncpa [#allocation6], 1 }
 0x205   :  { %394 = vsyncpa [#allocation9], 1 }
 0x206   :  { %395 = vsyncpa [#allocation4], 1 }

</bundles_post_ra>
